<compile_context>
chip_gen: v7x
topology: tpu7x:2x2x1
jax: 0.10.0
libtpu: 0.0.40
codegen_flags: <defaults>
</compile_context>

<pallas_src>
import math
import functools

import numpy as np
import jax
import jax.numpy as jnp
from jax.experimental import pallas as pl
from jax.experimental.pallas import tpu as pltpu


# ---------------------------------------------------------------------------
# Glue: 1D discretisation (uniform grid covering the data range + margin).
# NOTE: grid size is data-dependent -> computed on concrete (non-traced)
# values, mirroring how the torch module produces a per-call grid.
# ---------------------------------------------------------------------------
class Discretisation1d:
    def __init__(self, points_per_unit=16, multiple=64, margin=0.1):
        self.points_per_unit = points_per_unit
        self.multiple = multiple
        self.margin = margin

    def __call__(self, *args):
        lo = min(float(np.min(np.asarray(a))) for a in args) - self.margin
        hi = max(float(np.max(np.asarray(a))) for a in args) + self.margin
        raw = (hi - lo) * self.points_per_unit
        num = int(self.multiple * math.ceil(raw / self.multiple))
        return jnp.linspace(lo, hi, num, dtype=jnp.float32)  # (G,)


def _round_up(x, m):
    return ((x + m - 1) // m) * m


# ---------------------------------------------------------------------------
# Pallas kernel.
#   coef_ref : SMEM (1,)            -0.5 / exp(2*log_scale)   (scalar prefetch)
#   xz_ref   : VMEM (Bb, Nt, 1)     context inputs (column)
#   xg_ref   : VMEM (1, Gt)         discretisation-grid tile (row)
#   zt_ref   : VMEM (Bb, C, Nt)     [density ; z] transposed, C = 1 + dim_y
#   out_ref  : VMEM (Bb, C, Gt)     encoded representation tile (NCW)
#   acc_ref  : VMEM (Bb, C, Gt) f32 accumulator over N tiles
# ---------------------------------------------------------------------------
def setconv_kernel(coef_ref, xz_ref, xg_ref, zt_ref, out_ref, acc_ref,
                   *, weights_dtype):
    n = pl.program_id(2)
    bb, c, _ = acc_ref.shape

    @pl.when(n == 0)
    def _init():
        acc_ref[...] = jnp.zeros_like(acc_ref)

    coef = coef_ref[0]                      # -0.5 / exp(2*log_scale)
    xg = xg_ref[...]                        # (1, Gt)

    # Static unrolled loop over the batch block (Bb is small, e.g. <= 4).
    for b in range(bb):
        diff = xz_ref[b] - xg               # (Nt, 1) - (1, Gt) -> (Nt, Gt)
        q = (coef * diff * diff).astype(weights_dtype)
        w = jnp.exp(q)                      # (Nt, Gt) RBF weights
        # (C, Nt) @ (Nt, Gt) -> (C, Gt); f32 accumulation on the MXU.
        acc_ref[b] += jnp.dot(zt_ref[b], w, preferred_element_type=jnp.float32)

    @pl.when(n == pl.num_programs(2) - 1)
    def _finalize():
        for b in range(bb):
            acc = acc_ref[b]                # (C, Gt) f32
            density = acc[0:1, :]           # (1, Gt)
            out_ref[b, 0:1, :] = density.astype(out_ref.dtype)
            if c > 1:
                # One reciprocal + multiplies instead of per-channel divides.
                # (approx=True would be cheaper but changes numerics slightly.)
                inv = pl.reciprocal(density + 1e-8, approx=False)
                out_ref[b, 1:, :] = (acc[1:, :] * inv).astype(out_ref.dtype)


# ---------------------------------------------------------------------------
# Wrapper (mirrors SetConv1dEncoder.forward)
# ---------------------------------------------------------------------------
def setconv1d_encode(xz, z, x, log_scale, disc, *, weights_dtype=jnp.float32):
    B_, N, _ = xz.shape
    dim_y = z.shape[2]

    x_grid = disc(xz, x)                    # (G,)
    G = int(x_grid.shape[0])

    # Empty-context branch (static shape check; torch module hard-codes 2 ch).
    if N == 0:
        return x_grid, jnp.zeros((B_, 2, G), z.dtype)

    C = dim_y + 1

    # ---- tile sizes --------------------------------------------------------
    GP = _round_up(G, 128)                  # lane-dense (128-aligned) grid len
    GT = next(t for t in (1024, 512, 256, 128) if GP % t == 0)
    NT = N if N <= 1024 else 512            # context (reduction) tile
    NP = _round_up(N, NT)
    BB = min(B_, 4)                         # batch elements per grid step
    BP = _round_up(B_, BB)

    # ---- operand prep ------------------------------------------------------
    density = jnp.ones((B_, N, 1), z.dtype)
    z_aug = jnp.concatenate([density, z], axis=2)               # (B, N, C)
    zt = jnp.transpose(z_aug, (0, 2, 1)).astype(weights_dtype)  # (B, C, N)
    xzf = xz.astype(jnp.float32)                                # (B, N, 1)
    if BP != B_ or NP != N:
        # Zero-padded context points / batch rows contribute nothing.
        zt = jnp.pad(zt, ((0, BP - B_), (0, 0), (0, NP - N)))
        xzf = jnp.pad(xzf, ((0, BP - B_), (0, NP - N), (0, 0)))

    xg_row = x_grid.reshape(1, G).astype(jnp.float32)           # (1, G)
    if GP != G:
        # Padded grid columns produce valid (finite) values and are sliced off.
        xg_row = jnp.pad(xg_row, ((0, 0), (0, GP - G)), mode="edge")

    coef = (-0.5 / jnp.exp(2.0 * log_scale)).reshape(1).astype(jnp.float32)

    # ---- explicit VMEM budget for the chosen tiles (headroom, capped) ------
    wbytes = np.dtype(weights_dtype).itemsize
    est = (2 * (BB * NT * 4 + BB * C * NT * wbytes + GT * 4 + BB * C * GT * 4)
           + BB * C * GT * 4                 # f32 accumulator scratch
           + BB * NT * GT * wbytes)          # worst-case live weight tiles
    vmem_limit = int(min(max(2 * est, 16 * 1024 * 1024), 48 * 1024 * 1024))

    grid = (BP // BB, GP // GT, NP // NT)
    kernel = functools.partial(setconv_kernel, weights_dtype=weights_dtype)

    out = pl.pallas_call(
        kernel,
        out_shape=jax.ShapeDtypeStruct((BP, C, GP), z.dtype),
        grid_spec=pltpu.PrefetchScalarGridSpec(
            num_scalar_prefetch=1,
            grid=grid,
            in_specs=[
                pl.BlockSpec((BB, NT, 1), lambda b, g, n, coef_ref: (b, n, 0)),
                pl.BlockSpec((1, GT), lambda b, g, n, coef_ref: (0, g)),
                pl.BlockSpec((BB, C, NT), lambda b, g, n, coef_ref: (b, 0, n)),
            ],
            out_specs=pl.BlockSpec(
                (BB, C, GT), lambda b, g, n, coef_ref: (b, 0, g)
            ),
            scratch_shapes=[pltpu.VMEM((BB, C, GT), jnp.float32)],
        ),
        compiler_params=pltpu.CompilerParams(
            dimension_semantics=("parallel", "parallel", "arbitrary"),
            vmem_limit_bytes=vmem_limit,
        ),
    )(coef, xzf, xg_row, zt)

    if BP != B_ or GP != G:
        out = out[:B_, :, :G]
    return x_grid, out


# ---------------------------------------------------------------------------
# Pure-JAX reference (mirrors the B.* ops of the torch module).
# ---------------------------------------------------------------------------
def reference(xz, z, x_grid, log_scale):
    B_, N, _ = xz.shape
    density = jnp.ones((B_, N, 1), z.dtype)
    z_aug = jnp.concatenate([density, z], axis=2)                  # (B, N, C)
    dists2 = (x_grid[None, :, None] - xz[:, None, :, 0]) ** 2      # (B, G, N)
    weights = jnp.exp(-0.5 * dists2 / jnp.exp(2.0 * log_scale))    # (B, G, N)
    out = jnp.einsum("bgn,bnc->bgc", weights, z_aug)               # (B, G, C)
    out = jnp.concatenate(
        [out[:, :, :1], out[:, :, 1:] / (out[:, :, :1] + 1e-8)], axis=2
    )
    return jnp.transpose(out, (0, 2, 1))                           # (B, C, G)


if __name__ == "__main__":
    key = jax.random.PRNGKey(0)
    k1, k2, k3 = jax.random.split(key, 3)

    batch, n_ctx, n_tgt, dim_y = 2, 8, 12, 3
    xz = jax.random.uniform(k1, (batch, n_ctx, 1), jnp.float32, -1.0, 1.0)
    z = jax.random.normal(k2, (batch, n_ctx, dim_y), jnp.float32)
    x = jax.random.uniform(k3, (batch, n_tgt, 1), jnp.float32, -1.0, 1.0)

    # multiple=128 keeps the grid lane-dense (the wrapper pads/slices anyway).
    disc = Discretisation1d(points_per_unit=16, multiple=128, margin=0.1)
    # Deterministic parameter init, as in __init__: log_scale = log(2 / ppu)
    log_scale = jnp.log(jnp.float32(2.0 / disc.points_per_unit))

    x_grid, z_enc = setconv1d_encode(xz, z, x, log_scale, disc)
    jax.block_until_ready(z_enc)

    z_ref = reference(xz, z, x_grid, log_scale)
    assert z_enc.shape == (batch, dim_y + 1, x_grid.shape[0])
    np.testing.assert_allclose(
        np.asarray(z_enc), np.asarray(z_ref), rtol=1e-5, atol=1e-5
    )
    print("KERNEL_OK")
</pallas_src>

<mosaic_0001>
module attributes {stable_mosaic.version = 11 : i64} {
  func.func @setconv_kernel(%arg0: i32, %arg1: i32, %arg2: i32, %arg3: memref<1xf32, #tpu.memory_space<smem>>, %arg4: memref<2x8x1xf32, #tpu.memory_space<vmem>>, %arg5: memref<1x128xf32, #tpu.memory_space<vmem>>, %arg6: memref<2x4x8xf32, #tpu.memory_space<vmem>>, %arg7: memref<2x4x128xf32, #tpu.memory_space<vmem>>, %arg8: memref<2x4x128xf32, #tpu.memory_space<vmem>>) attributes {dimension_semantics = [#tpu.dimension_semantics<parallel>, #tpu.dimension_semantics<parallel>, #tpu.dimension_semantics<arbitrary>], iteration_bounds = array<i64: 1, 1, 1>, scalar_prefetch = 1 : i64, scratch_operands = 1 : i64, tpu.core_type = #tpu.core_type<tc>, window_params = [{transform_indices = @transform_0, window_bounds = array<i64: 2, 8, 1>}, {transform_indices = @transform_1, window_bounds = array<i64: 1, 128>}, {transform_indices = @transform_2, window_bounds = array<i64: 2, 4, 8>}, {transform_indices = @transform_3, window_bounds = array<i64: 2, 4, 128>}]} {
    %c0_i32 = arith.constant 0 : i32
    %0 = arith.cmpi eq, %arg2, %c0_i32 : i32
    %1 = arith.extui %0 : i1 to i32
    %c0_i32_0 = arith.constant 0 : i32
    %2 = arith.cmpi ne, %1, %c0_i32_0 : i32
    scf.if %2 {
      %cst_29 = arith.constant 0.000000e+00 : f32
      %44 = vector.broadcast %cst_29 : f32 to vector<2x4x128xf32>
      %c0_30 = arith.constant 0 : index
      %c0_31 = arith.constant 0 : index
      %c0_32 = arith.constant 0 : index
      %45 = vector.load %arg8[%c0_30, %c0_31, %c0_32] : memref<2x4x128xf32, #tpu.memory_space<vmem>>, vector<2x4x128xf32>
      tpu.vector_store %arg8[%c0_30, %c0_31, %c0_32], %44 {strides = array<i32>} : memref<2x4x128xf32, #tpu.memory_space<vmem>>, vector<2x4x128xf32>,
    } else {
    }
    %c0 = arith.constant 0 : index
    %3 = memref.load %arg3[%c0] : memref<1xf32, #tpu.memory_space<smem>>
    %c0_1 = arith.constant 0 : index
    %c0_2 = arith.constant 0 : index
    %4 = vector.load %arg5[%c0_1, %c0_2] : memref<1x128xf32, #tpu.memory_space<vmem>>, vector<1x128xf32>
    %c0_3 = arith.constant 0 : index
    %c0_4 = arith.constant 0 : index
    %c0_5 = arith.constant 0 : index
    %5 = vector.load %arg4[%c0_3, %c0_4, %c0_5] : memref<2x8x1xf32, #tpu.memory_space<vmem>>, vector<1x8x1xf32>
    %6 = vector.shape_cast %5 : vector<1x8x1xf32> to vector<8x1xf32>
    %7 = vector.broadcast %6 : vector<8x1xf32> to vector<8x128xf32>
    %8 = vector.broadcast %4 : vector<1x128xf32> to vector<8x128xf32>
    %9 = arith.subf %7, %8 : vector<8x128xf32>
    %10 = vector.broadcast %3 : f32 to vector<8x128xf32>
    %11 = arith.mulf %10, %9 : vector<8x128xf32>
    %12 = arith.mulf %11, %9 : vector<8x128xf32>
    %13 = math.exp %12 : vector<8x128xf32>
    %c0_6 = arith.constant 0 : index
    %c0_7 = arith.constant 0 : index
    %c0_8 = arith.constant 0 : index
    %14 = vector.load %arg8[%c0_6, %c0_7, %c0_8] : memref<2x4x128xf32, #tpu.memory_space<vmem>>, vector<1x4x128xf32>
    %15 = vector.shape_cast %14 : vector<1x4x128xf32> to vector<4x128xf32>
    %c0_9 = arith.constant 0 : index
    %c0_10 = arith.constant 0 : index
    %c0_11 = arith.constant 0 : index
    %16 = vector.load %arg6[%c0_9, %c0_10, %c0_11] : memref<2x4x8xf32, #tpu.memory_space<vmem>>, vector<1x4x8xf32>
    %17 = vector.shape_cast %16 : vector<1x4x8xf32> to vector<4x8xf32>
    %cst = arith.constant dense<0.000000e+00> : vector<4x128xf32>
    %18 = tpu.matmul %17, %13, %cst {dimension_numbers = #tpu.dot_dimension_numbers<[1], [0], [0], [1], [0, 0, 1, 1], [], []>} : vector<4x8xf32>, vector<8x128xf32>, vector<4x128xf32> -> vector<4x128xf32>
    %19 = arith.addf %15, %18 : vector<4x128xf32>
    %c0_12 = arith.constant 0 : index
    %c0_13 = arith.constant 0 : index
    %c0_14 = arith.constant 0 : index
    %20 = vector.load %arg8[%c0_12, %c0_13, %c0_14] : memref<2x4x128xf32, #tpu.memory_space<vmem>>, vector<1x4x128xf32>
    %21 = vector.shape_cast %20 : vector<1x4x128xf32> to vector<4x128xf32>
    %22 = vector.shape_cast %19 : vector<4x128xf32> to vector<1x4x128xf32>
    tpu.vector_store %arg8[%c0_12, %c0_13, %c0_14], %22 {strides = array<i32>} : memref<2x4x128xf32, #tpu.memory_space<vmem>>, vector<1x4x128xf32>,
    %c1 = arith.constant 1 : index
    %c0_15 = arith.constant 0 : index
    %c0_16 = arith.constant 0 : index
    %23 = vector.load %arg4[%c1, %c0_15, %c0_16] : memref<2x8x1xf32, #tpu.memory_space<vmem>>, vector<1x8x1xf32>
    %24 = vector.shape_cast %23 : vector<1x8x1xf32> to vector<8x1xf32>
    %25 = vector.broadcast %24 : vector<8x1xf32> to vector<8x128xf32>
    %26 = vector.broadcast %4 : vector<1x128xf32> to vector<8x128xf32>
    %27 = arith.subf %25, %26 : vector<8x128xf32>
    %28 = vector.broadcast %3 : f32 to vector<8x128xf32>
    %29 = arith.mulf %28, %27 : vector<8x128xf32>
    %30 = arith.mulf %29, %27 : vector<8x128xf32>
    %31 = math.exp %30 : vector<8x128xf32>
    %c1_17 = arith.constant 1 : index
    %c0_18 = arith.constant 0 : index
    %c0_19 = arith.constant 0 : index
    %32 = vector.load %arg8[%c1_17, %c0_18, %c0_19] : memref<2x4x128xf32, #tpu.memory_space<vmem>>, vector<1x4x128xf32>
    %33 = vector.shape_cast %32 : vector<1x4x128xf32> to vector<4x128xf32>
    %c1_20 = arith.constant 1 : index
    %c0_21 = arith.constant 0 : index
    %c0_22 = arith.constant 0 : index
    %34 = vector.load %arg6[%c1_20, %c0_21, %c0_22] : memref<2x4x8xf32, #tpu.memory_space<vmem>>, vector<1x4x8xf32>
    %35 = vector.shape_cast %34 : vector<1x4x8xf32> to vector<4x8xf32>
    %cst_23 = arith.constant dense<0.000000e+00> : vector<4x128xf32>
    %36 = tpu.matmul %35, %31, %cst_23 {dimension_numbers = #tpu.dot_dimension_numbers<[1], [0], [0], [1], [0, 0, 1, 1], [], []>} : vector<4x8xf32>, vector<8x128xf32>, vector<4x128xf32> -> vector<4x128xf32>
    %37 = arith.addf %33, %36 : vector<4x128xf32>
    %c1_24 = arith.constant 1 : index
    %c0_25 = arith.constant 0 : index
    %c0_26 = arith.constant 0 : index
    %38 = vector.load %arg8[%c1_24, %c0_25, %c0_26] : memref<2x4x128xf32, #tpu.memory_space<vmem>>, vector<1x4x128xf32>
    %39 = vector.shape_cast %38 : vector<1x4x128xf32> to vector<4x128xf32>
    %40 = vector.shape_cast %37 : vector<4x128xf32> to vector<1x4x128xf32>
    tpu.vector_store %arg8[%c1_24, %c0_25, %c0_26], %40 {strides = array<i32>} : memref<2x4x128xf32, #tpu.memory_space<vmem>>, vector<1x4x128xf32>,
    %c0_i32_27 = arith.constant 0 : i32
    %41 = arith.cmpi eq, %arg2, %c0_i32_27 : i32
    %42 = arith.extui %41 : i1 to i32
    %c0_i32_28 = arith.constant 0 : i32
    %43 = arith.cmpi ne, %42, %c0_i32_28 : i32
    scf.if %43 {
      %c0_29 = arith.constant 0 : index
      %c0_30 = arith.constant 0 : index
      %c0_31 = arith.constant 0 : index
      %44 = vector.load %arg8[%c0_29, %c0_30, %c0_31] : memref<2x4x128xf32, #tpu.memory_space<vmem>>, vector<1x4x128xf32>
      %45 = vector.shape_cast %44 : vector<1x4x128xf32> to vector<4x128xf32>
      %46 = vector.extract_strided_slice %45 {offsets = [0, 0], sizes = [1, 128], strides = [1, 1]} : vector<4x128xf32> to vector<1x128xf32>
      %c0_32 = arith.constant 0 : index
      %c0_33 = arith.constant 0 : index
      %c0_34 = arith.constant 0 : index
      %47 = vector.load %arg7[%c0_32, %c0_33, %c0_34] : memref<2x4x128xf32, #tpu.memory_space<vmem>>, vector<1x1x128xf32>
      %48 = vector.shape_cast %47 : vector<1x1x128xf32> to vector<1x128xf32>
      %49 = vector.shape_cast %46 : vector<1x128xf32> to vector<1x1x128xf32>
      tpu.vector_store %arg7[%c0_32, %c0_33, %c0_34], %49 {strides = array<i32>} : memref<2x4x128xf32, #tpu.memory_space<vmem>>, vector<1x1x128xf32>,
      %cst_35 = arith.constant 9.99999993E-9 : f32
      %50 = vector.broadcast %cst_35 : f32 to vector<1x128xf32>
      %51 = arith.addf %46, %50 : vector<1x128xf32>
      %52 = tpu.reciprocal %51 : vector<1x128xf32> -> vector<1x128xf32>
      %53 = vector.extract_strided_slice %45 {offsets = [1, 0], sizes = [3, 128], strides = [1, 1]} : vector<4x128xf32> to vector<3x128xf32>
      %54 = vector.broadcast %52 : vector<1x128xf32> to vector<3x128xf32>
      %55 = arith.mulf %53, %54 : vector<3x128xf32>
      %c0_36 = arith.constant 0 : index
      %c1_37 = arith.constant 1 : index
      %c0_38 = arith.constant 0 : index
      %56 = vector.load %arg7[%c0_36, %c1_37, %c0_38] : memref<2x4x128xf32, #tpu.memory_space<vmem>>, vector<1x3x128xf32>
      %57 = vector.shape_cast %56 : vector<1x3x128xf32> to vector<3x128xf32>
      %58 = vector.shape_cast %55 : vector<3x128xf32> to vector<1x3x128xf32>
      tpu.vector_store %arg7[%c0_36, %c1_37, %c0_38], %58 {strides = array<i32>} : memref<2x4x128xf32, #tpu.memory_space<vmem>>, vector<1x3x128xf32>,
      %c1_39 = arith.constant 1 : index
      %c0_40 = arith.constant 0 : index
      %c0_41 = arith.constant 0 : index
      %59 = vector.load %arg8[%c1_39, %c0_40, %c0_41] : memref<2x4x128xf32, #tpu.memory_space<vmem>>, vector<1x4x128xf32>
      %60 = vector.shape_cast %59 : vector<1x4x128xf32> to vector<4x128xf32>
      %61 = vector.extract_strided_slice %60 {offsets = [0, 0], sizes = [1, 128], strides = [1, 1]} : vector<4x128xf32> to vector<1x128xf32>
      %c1_42 = arith.constant 1 : index
      %c0_43 = arith.constant 0 : index
      %c0_44 = arith.constant 0 : index
      %62 = vector.load %arg7[%c1_42, %c0_43, %c0_44] : memref<2x4x128xf32, #tpu.memory_space<vmem>>, vector<1x1x128xf32>
      %63 = vector.shape_cast %62 : vector<1x1x128xf32> to vector<1x128xf32>
      %64 = vector.shape_cast %61 : vector<1x128xf32> to vector<1x1x128xf32>
      tpu.vector_store %arg7[%c1_42, %c0_43, %c0_44], %64 {strides = array<i32>} : memref<2x4x128xf32, #tpu.memory_space<vmem>>, vector<1x1x128xf32>,
      %cst_45 = arith.constant 9.99999993E-9 : f32
      %65 = vector.broadcast %cst_45 : f32 to vector<1x128xf32>
      %66 = arith.addf %61, %65 : vector<1x128xf32>
      %67 = tpu.reciprocal %66 : vector<1x128xf32> -> vector<1x128xf32>
      %68 = vector.extract_strided_slice %60 {offsets = [1, 0], sizes = [3, 128], strides = [1, 1]} : vector<4x128xf32> to vector<3x128xf32>
      %69 = vector.broadcast %67 : vector<1x128xf32> to vector<3x128xf32>
      %70 = arith.mulf %68, %69 : vector<3x128xf32>
      %c1_46 = arith.constant 1 : index
      %c1_47 = arith.constant 1 : index
      %c0_48 = arith.constant 0 : index
      %71 = vector.load %arg7[%c1_46, %c1_47, %c0_48] : memref<2x4x128xf32, #tpu.memory_space<vmem>>, vector<1x3x128xf32>
      %72 = vector.shape_cast %71 : vector<1x3x128xf32> to vector<3x128xf32>
      %73 = vector.shape_cast %70 : vector<3x128xf32> to vector<1x3x128xf32>
      tpu.vector_store %arg7[%c1_46, %c1_47, %c0_48], %73 {strides = array<i32>} : memref<2x4x128xf32, #tpu.memory_space<vmem>>, vector<1x3x128xf32>,
    } else {
    }
    return
  }
  func.func @transform_0(%arg0: i32, %arg1: i32, %arg2: i32, %arg3: memref<1xf32, #tpu.memory_space<smem>>) -> (i32, i32, i32) {
    %c0_i32 = arith.constant 0 : i32
    %c0_i32_0 = arith.constant 0 : i32
    return %arg0, %arg2, %c0_i32 : i32, i32, i32
  }
  func.func @transform_1(%arg0: i32, %arg1: i32, %arg2: i32, %arg3: memref<1xf32, #tpu.memory_space<smem>>) -> (i32, i32) {
    %c0_i32 = arith.constant 0 : i32
    %c0_i32_0 = arith.constant 0 : i32
    return %c0_i32, %arg1 : i32, i32
  }
  func.func @transform_2(%arg0: i32, %arg1: i32, %arg2: i32, %arg3: memref<1xf32, #tpu.memory_space<smem>>) -> (i32, i32, i32) {
    %c0_i32 = arith.constant 0 : i32
    %c0_i32_0 = arith.constant 0 : i32
    return %arg0, %c0_i32, %arg2 : i32, i32, i32
  }
  func.func @transform_3(%arg0: i32, %arg1: i32, %arg2: i32, %arg3: memref<1xf32, #tpu.memory_space<smem>>) -> (i32, i32, i32) {
    %c0_i32 = arith.constant 0 : i32
    %c0_i32_0 = arith.constant 0 : i32
    return %arg0, %c0_i32, %arg1 : i32, i32, i32
  }
}

</mosaic_0001>

<bundles_post_ra>
// kernel: tpu_custom_call.1
= control target key start
LH: loop header
LB: loop body
LE: loop exit
PB: predicated region body
PF: predicated region fallthrough
CT: control target
= control target key end

     0   :  { %s371_s0 = inlined_call_operand.<no memory space> [shape: f32[1], index: 0, kind: input, shape index: {}]   ;;  %s372_s1 = inlined_call_operand.vmem [shape: f32[2,8,1], index: 1, kind: input, shape index: {}]   ;;  %s373_s2 = inlined_call_operand.vmem [shape: f32[1,128], index: 2, kind: input, shape index: {}]   ;;  %s374_s3 = inlined_call_operand.vmem [shape: f32[2,4,8], index: 3, kind: input, shape index: {}]   ;;  %s375_s4 = inlined_call_operand.hbm [shape: f32[2,4,128], index: 4, kind: output, shape index: {}]  }
   0x1   :  { %v25_v0 = vld [vmem:[%s372_s1] sm:$0xff] }
   0x2   :  { %10 = vsyncpa [#allocation6], 0  ;;  %v310_v1 = vmov 0   ;;  %v254_v2 = vld [vmem:[%s372_s1 + $0x8] sm:$0xff]  ;;  %v311_v3 = vmov 0.0   ;;  %vm312_vm0 = vmmov 0   ;;  %v38_v5 = vstv %s371_s0 }
   0x3   :  { %277 = vset.pattern.permute.xlu0 %v310_v1  ;;  %261 = vmatprep.subr.mxu0 %v311_v3  ;;  %21 = vst [vmem:[#allocation2] sm:$0xf] %v311_v3  ;;  %22 = vst [vmem:[#allocation2 + $0x4] sm:$0xf] %v311_v3  ;;  %v252_v4 = vld [vmem:[%s373_s2] ss:$0 sm:$0xff]  ;;  %v219_v30 = vlaneseq }
   0x4   :  { %28 = vperm.xlu0 %277, %v25_v0   ;;  %266 = vmatprep.subr.mxu1 %v311_v3  ;;  %v44_v16 = vld [vmem:[%s374_s3] sm:$0xf]  ;;  %vm45_vm1 = vcmask 64512   ;;  %v255_v18 = vld [vmem:[%s374_s3 + $0x4] sm:$0xf]  ;;  %s313_s3 = smov [#allocation5]  }
   0x5   :  { %263 = vmatprep.mubr.msk.f32.mxu0 %vm312_vm0, %v311_v3  ;;  %268 = vmatprep.mubr.msk.f32.mxu1 %vm312_vm0, %v311_v3  ;;  %v220_v33 = vshrl.u32 %v219_v30, 7  ;;  %s241_s24 = sshll.u32 %s313_s3, 4  ;;  %s242_s24 = int_to_ptr.vmem [resolvable:$true] %s241_s24 }
   0x6   :  { %s286_s25 = scalar_lea.vmem %s242_s24, 128  ;;  %p291_p1 = scmp.lt.s32.totalorder %s242_s24, %s242_s24 }
   0x7   :  { %v221_v34 = vsub.s32 0, %v220_v33  ;;  %p287_p0 = scmp.ne.s32.totalorder %s242_s24, %s286_s25  ;;  %p292_p2 = scmp.lt.s32.totalorder %s286_s25, %s286_s25 }
   0x8   :  { %125 = vperm.xlu0 %277, %v254_v2  }
   0x9   :  { %p293_p3 = por %p292_p2, %p291_p1 }
   0xa   :  { %v43_v20 = vld [vmem:[#allocation2] sm:$0xf]  ;;  %v134_v24 = vld [vmem:[#allocation2 + $0x4] sm:$0xf] }
   0xb   :  { %p294_p4 = pnand %p293_p3, %p287_p0 }
  0x83   :  { %v29_v6 = vpop.permute.xlu0 %28 }
  0x84   :  { %v37_v7 = vsub.f32 %v29_v6, %v252_v4 }
  0x86   :  { %v39_v8 = vmul.f32 %v38_v5, %v37_v7 }
  0x87   :  { %v126_v9 = vpop.permute.xlu0 %125 }
  0x88   :  { %v40_v10 = vmul.f32 %v39_v8, %v37_v7  ;;  %v128_v11 = vsub.f32 %v126_v9, %v252_v4 }
  0x8a   :  { %v41_v12 = vmul.f32 1.442695, %v40_v10  ;;  %v129_v13 = vmul.f32 %v128_v11, %v38_v5 }
  0x8c   :  { %278 = vpow2.f32 %v41_v12  ;;  %v130_v14 = vmul.f32 %v129_v13, %v128_v11 }
  0x8e   :  { %v131_v15 = vmul.f32 1.442695, %v130_v14 }
  0x90   :  { %280 = vpow2.f32 %v131_v15 }
  0x96   :  { %v279_v17 = vpop.eup %278 }
  0x97   :  { %262 = vmatpush3.msra.mxu0 %v279_v17 }
  0x98   :  { %264 = vmatmul.mubr.msk.f32.vlgmr.msra.gmra.mrb[0].mxu0 %vm45_vm1, %v44_v16 }
  0x9a   :  { %v281_v19 = vpop.eup %280 }
  0x9b   :  { %267 = vmatpush3.msra.mxu1 %v281_v19 }
  0x9c   :  { %269 = vmatmul.mubr.msk.f32.vlgmr.msra.gmra.mrb[0].mxu1 %vm45_vm1, %v255_v18 }
 0x16b   :  { %v115_v21 = vpop.f32.mrb[0].mxu0 }
 0x16c   :  { %v119_v22 = vadd.f32 %v115_v21, %v43_v20  ;;  %v265_v23 = vpop.f32.mrb[1].mxu0 }
 0x16e   :  { %120 = vst [vmem:[#allocation2] sm:$0xf] %v119_v22 }
 0x16f   :  { %v206_v25 = vpop.f32.mrb[0].mxu1 }
 0x170   :  { %v210_v26 = vadd.f32 %v206_v25, %v134_v24  ;;  %v270_v27 = vpop.f32.mrb[1].mxu1 }
 0x172   :  { %211 = vst [vmem:[#allocation2 + $0x4] sm:$0xf] %v210_v26 }
 0x175   :  { %v215_v28 = vld [vmem:[#allocation2] sm:$0xf] }
 0x176   :  { %216 = vst [vmem:[#allocation5] sm:$0x1] %v215_v28  ;;  %v217_v29 = vadd.f32 1e-08, %v215_v28 }
 0x178   :  { %282 = vrcp.f32 %v217_v29 }
 0x179   :  { %v225_v31 = vld [vmem:[#allocation2 + $0x4] sm:$0xf] }
 0x17a   :  { %227 = vst [vmem:[#allocation5 + $0x4] sm:$0x1] %v225_v31  ;;  %v228_v32 = vadd.f32 1e-08, %v225_v31 }
 0x17c   :  { %284 = vrcp.f32 %v228_v32 }
 0x182   :  { %v283_v35 = vpop.eup %282 }
 0x183   :  { %v222_v36 = vrot.slane %v283_v35, %v221_v34 }
 0x185   :  { %v223_v37 = vmul.f32 %v222_v36, %v215_v28 }
 0x186   :  { %v285_v38 = vpop.eup %284 }
 0x187   :  { %224 = vst [vmem:[#allocation5] sm:$0xe] %v223_v37  ;;  %v233_v39 = vrot.slane %v285_v38, %v221_v34 }
 0x189   :  { %v234_v40 = vmul.f32 %v233_v39, %v225_v31 }
 0x18b   :  { %235 = vst [vmem:[#allocation5 + $0x4] sm:$0xe] %v234_v40 }
 0x18c   :  { %297 = shalt.err (!%p294_p4)
}
 0x18d   :  { %s298_s28 = scalar_lea.hbm %s375_s4, 128 }
 0x18e   :  { %p299_p5 = scmp.ne.s32.totalorder %s375_s4, %s298_s28  ;;  %p302_p6 = scmp.lt.u32.totalorder %s298_s28, %s375_s4 }
 0x190   :  { %p304_p7 = pnand %p302_p6, %p299_p5 }
 0x192   :  { %307 = shalt.err (!%p304_p7)
}
 0x193   :  { %s314_s7 = smov 64   ;;  %s315_s8 = smov 4  }
 0x194   :  { %247 = dma.vmem_to_hbm [thread:$0]  %s242_s24, 128, %s375_s4, [#allocation6], %s314_s7, %s314_s7, %s315_s8  }
 0x195   :  { %308 = dma.done.wait [#allocation6], 128  }
 0x196   :  { %309 = vsyncadd [#allocation6], 4294967168 }
 0x197   :  { %251 = vsyncpa [#allocation6], 1 }

</bundles_post_ra>
